<compile_context>
chip_gen: v7x
topology: tpu7x:2x2x1
jax: 0.10.0
libtpu: 0.0.40
codegen_flags: <defaults>
</compile_context>

<pallas_src>
import functools

import jax
import jax.numpy as jnp
from jax import lax
from jax.experimental import pallas as pl
from jax.experimental.pallas import tpu as pltpu


def _brier_kernel(x_ref, t_ref, o_ref, *, hw, tile_cols):
    j = pl.program_id(1)

    @pl.when(j == 0)
    def _():
        o_ref[...] = jnp.zeros_like(o_ref)

    x = x_ref[0].astype(jnp.float32)   # (C, TC): classes on sublanes
    t = t_ref[0]                       # (1, TC): int32 targets (lane dense)
    c, tc = x.shape

    # Numerically stable softmax over the class (sublane) axis.
    m = jnp.max(x, axis=0, keepdims=True)                 # (1, TC)
    e = jnp.exp(x - m)                                    # (C, TC)
    denom = jnp.sum(e, axis=0, keepdims=True)             # (1, TC)
    p = e * pl.reciprocal(denom, approx=True)             # EUP, not VALU divide

    # One-hot of the target along the class axis.
    cls = lax.broadcasted_iota(jnp.int32, (c, tc), 0)
    one_hot = (cls == t).astype(jnp.float32)

    colsum = jnp.sum((one_hot - p) ** 2, axis=0, keepdims=True)   # (1, TC)

    if hw % tile_cols == 0:
        # No ragged tail: every column valid, no masking anywhere.
        o_ref[0] += colsum
    else:
        last = pl.num_programs(1) - 1

        @pl.when(j != last)
        def _():
            o_ref[0] += colsum

        @pl.when(j == last)
        def _():
            # Only the ragged last tile pays for the mask (garbage columns,
            # including any NaN/Inf they produce, are discarded by the where).
            col = lax.broadcasted_iota(jnp.int32, (1, tc), 1)
            valid = col < (hw - j * tile_cols)
            o_ref[0] += jnp.where(valid, colsum, 0.0)


def brier_score(logits, target, *, tile_bytes=4 * 1024 * 1024):
    """Pallas equivalent of BrierScore.forward.

    # TODO(synk): use_gpu / .cuda() device placement has no TPU equivalent; ignored.
    """
    if logits.ndim > 2:
        # NCHW... -> (N, C, HW): a free reshape, no HBM transpose / pad.
        n, c = logits.shape[0], logits.shape[1]
        x = logits.reshape(n, c, -1)
    else:
        # (R, C) classification logits: classes to sublanes, rows to lanes.
        n, c = 1, logits.shape[1]
        x = jnp.transpose(logits, (1, 0))[None]     # (1, C, R)
    hw = x.shape[2]
    rows = n * hw                                   # == input.shape[0] in torch

    t = target.reshape(n, 1, hw).astype(jnp.int32)

    # Lane-axis tile: as large as fits a ~tile_bytes logits tile (double
    # buffered this stays well under the scoped-VMEM default on v5e/v6e/v7x),
    # multiple of 128, or the full row extent if that is smaller.
    tc_budget = max(128, (tile_bytes // (4 * c)) // 128 * 128)
    tile_cols = hw if hw <= tc_budget else tc_budget
    grid = (n, pl.cdiv(hw, tile_cols))

    kernel = functools.partial(_brier_kernel, hw=hw, tile_cols=tile_cols)

    partials = pl.pallas_call(
        kernel,
        out_shape=jax.ShapeDtypeStruct((n, 1, tile_cols), jnp.float32),
        grid_spec=pltpu.PrefetchScalarGridSpec(
            num_scalar_prefetch=0,
            grid=grid,
            in_specs=[
                pl.BlockSpec((1, c, tile_cols), lambda i, j: (i, 0, j)),
                pl.BlockSpec((1, 1, tile_cols), lambda i, j: (i, 0, j)),
            ],
            out_specs=pl.BlockSpec((1, 1, tile_cols), lambda i, j: (i, 0, 0)),
        ),
        compiler_params=pltpu.CompilerParams(
            dimension_semantics=("parallel", "arbitrary")),
    )(x, t)

    # Tiny final reduction + normalization (O(n * tile_cols) elements).
    return jnp.sum(partials) / jnp.float32(rows)


def _brier_ref(logits, target):
    """Pure-JAX reference matching the PyTorch module."""
    if logits.ndim > 2:
        n, c = logits.shape[0], logits.shape[1]
        x = jnp.transpose(logits.reshape(n, c, -1), (0, 2, 1)).reshape(-1, c)
    else:
        x = logits
    t = target.reshape(-1)
    p = jax.nn.softmax(x.astype(jnp.float32), axis=-1)
    oh = jax.nn.one_hot(t, x.shape[1], dtype=jnp.float32)
    return jnp.sum((oh - p) ** 2) / jnp.float32(x.shape[0])


if __name__ == "__main__":
    key = jax.random.PRNGKey(0)
    k1, k2, k3, k4, k5, k6 = jax.random.split(key, 6)

    # Tolerances account for the approximate EUP reciprocal (~1e-4-level
    # relative error on the softmax denominator).
    RTOL = ATOL = 2e-3

    # 1) Segmentation-style inputs: logits NCHW, integer targets NHW.
    logits = jax.random.normal(k1, (2, 4, 16, 16), dtype=jnp.float32)
    target = jax.random.randint(k2, (2, 16, 16), 0, 4, dtype=jnp.int32)
    loss = jax.block_until_ready(brier_score(logits, target))
    ref = _brier_ref(logits, target)
    assert jnp.allclose(loss, ref, rtol=RTOL, atol=ATOL), (loss, ref)

    # 2) Plain classification logits (R, C).
    logits2 = jax.random.normal(k3, (8, 32), dtype=jnp.float32)
    target2 = jax.random.randint(k4, (8,), 0, 32, dtype=jnp.int32)
    loss2 = jax.block_until_ready(brier_score(logits2, target2))
    ref2 = _brier_ref(logits2, target2)
    assert jnp.allclose(loss2, ref2, rtol=RTOL, atol=ATOL), (loss2, ref2)

    # 3) Ragged last tile (exercises the masked-tail path): hw=300, tile=128.
    logits3 = jax.random.normal(k5, (2, 4, 15, 20), dtype=jnp.float32)
    target3 = jax.random.randint(k6, (2, 15, 20), 0, 4, dtype=jnp.int32)
    loss3 = jax.block_until_ready(brier_score(logits3, target3, tile_bytes=2048))
    ref3 = _brier_ref(logits3, target3)
    assert jnp.allclose(loss3, ref3, rtol=RTOL, atol=ATOL), (loss3, ref3)

    print("KERNEL_OK")
</pallas_src>

<mosaic_0001>
module attributes {stable_mosaic.version = 11 : i64} {
  func.func @_brier_kernel(%arg0: i32, %arg1: i32, %arg2: memref<1x4x256xf32, #tpu.memory_space<vmem>>, %arg3: memref<1x1x256xi32, #tpu.memory_space<vmem>>, %arg4: memref<1x1x256xf32, #tpu.memory_space<vmem>>) attributes {dimension_semantics = [#tpu.dimension_semantics<parallel>, #tpu.dimension_semantics<arbitrary>], iteration_bounds = array<i64: 2, 1>, scalar_prefetch = 0 : i64, scratch_operands = 0 : i64, tpu.core_type = #tpu.core_type<tc>, window_params = [{transform_indices = @transform_0, window_bounds = array<i64: 1, 4, 256>}, {transform_indices = @transform_1, window_bounds = array<i64: 1, 1, 256>}, {transform_indices = @transform_2, window_bounds = array<i64: 1, 1, 256>}]} {
    %c0_i32 = arith.constant 0 : i32
    %0 = arith.cmpi eq, %arg1, %c0_i32 : i32
    %1 = arith.extui %0 : i1 to i32
    %c0_i32_0 = arith.constant 0 : i32
    %2 = arith.cmpi ne, %1, %c0_i32_0 : i32
    scf.if %2 {
      %cst_14 = arith.constant 0.000000e+00 : f32
      %32 = vector.broadcast %cst_14 : f32 to vector<1x1x256xf32>
      %c0_15 = arith.constant 0 : index
      %c0_16 = arith.constant 0 : index
      %c0_17 = arith.constant 0 : index
      %33 = vector.load %arg4[%c0_15, %c0_16, %c0_17] : memref<1x1x256xf32, #tpu.memory_space<vmem>>, vector<1x1x256xf32>
      tpu.vector_store %arg4[%c0_15, %c0_16, %c0_17], %32 {strides = array<i32>} : memref<1x1x256xf32, #tpu.memory_space<vmem>>, vector<1x1x256xf32>,
    } else {
    }
    %c0 = arith.constant 0 : index
    %c0_1 = arith.constant 0 : index
    %c0_2 = arith.constant 0 : index
    %3 = vector.load %arg2[%c0, %c0_1, %c0_2] : memref<1x4x256xf32, #tpu.memory_space<vmem>>, vector<1x4x256xf32>
    %4 = vector.shape_cast %3 : vector<1x4x256xf32> to vector<4x256xf32>
    %c0_3 = arith.constant 0 : index
    %c0_4 = arith.constant 0 : index
    %c0_5 = arith.constant 0 : index
    %5 = vector.load %arg3[%c0_3, %c0_4, %c0_5] : memref<1x1x256xi32, #tpu.memory_space<vmem>>, vector<1x1x256xi32>
    %6 = vector.shape_cast %5 : vector<1x1x256xi32> to vector<1x256xi32>
    %cst = arith.constant dense<0xFF800000> : vector<256xf32>
    %7 = vector.multi_reduction <maximumf>, %4, %cst [0] : vector<4x256xf32> to vector<256xf32>
    %8 = vector.shape_cast %7 : vector<256xf32> to vector<1x256xf32>
    %9 = vector.broadcast %8 : vector<1x256xf32> to vector<4x256xf32>
    %10 = arith.subf %4, %9 : vector<4x256xf32>
    %11 = math.exp %10 : vector<4x256xf32>
    %cst_6 = arith.constant dense<0.000000e+00> : vector<256xf32>
    %12 = vector.multi_reduction <add>, %11, %cst_6 [0] : vector<4x256xf32> to vector<256xf32>
    %13 = vector.shape_cast %12 : vector<256xf32> to vector<1x256xf32>
    %14 = tpu.reciprocal %13 {approx = true} : vector<1x256xf32> -> vector<1x256xf32>
    %15 = vector.broadcast %14 : vector<1x256xf32> to vector<4x256xf32>
    %16 = arith.mulf %11, %15 : vector<4x256xf32>
    %17 = tpu.iota {dimensions = array<i32: 0>} : vector<4x256xi32>
    %18 = vector.broadcast %6 : vector<1x256xi32> to vector<4x256xi32>
    %19 = arith.cmpi eq, %17, %18 : vector<4x256xi32>
    %20 = arith.extui %19 : vector<4x256xi1> to vector<4x256xi32>
    %21 = arith.sitofp %20 : vector<4x256xi32> to vector<4x256xf32>
    %22 = arith.subf %21, %16 : vector<4x256xf32>
    %23 = arith.mulf %22, %22 : vector<4x256xf32>
    %cst_7 = arith.constant dense<0.000000e+00> : vector<256xf32>
    %24 = vector.multi_reduction <add>, %23, %cst_7 [0] : vector<4x256xf32> to vector<256xf32>
    %25 = vector.shape_cast %24 : vector<256xf32> to vector<1x256xf32>
    %c0_8 = arith.constant 0 : index
    %c0_9 = arith.constant 0 : index
    %c0_10 = arith.constant 0 : index
    %26 = vector.load %arg4[%c0_8, %c0_9, %c0_10] : memref<1x1x256xf32, #tpu.memory_space<vmem>>, vector<1x1x256xf32>
    %27 = vector.shape_cast %26 : vector<1x1x256xf32> to vector<1x256xf32>
    %28 = arith.addf %27, %25 : vector<1x256xf32>
    %c0_11 = arith.constant 0 : index
    %c0_12 = arith.constant 0 : index
    %c0_13 = arith.constant 0 : index
    %29 = vector.load %arg4[%c0_11, %c0_12, %c0_13] : memref<1x1x256xf32, #tpu.memory_space<vmem>>, vector<1x1x256xf32>
    %30 = vector.shape_cast %29 : vector<1x1x256xf32> to vector<1x256xf32>
    %31 = vector.shape_cast %28 : vector<1x256xf32> to vector<1x1x256xf32>
    tpu.vector_store %arg4[%c0_11, %c0_12, %c0_13], %31 {strides = array<i32>} : memref<1x1x256xf32, #tpu.memory_space<vmem>>, vector<1x1x256xf32>,
    return
  }
  func.func @transform_0(%arg0: i32, %arg1: i32) -> (i32, i32, i32) {
    %c0_i32 = arith.constant 0 : i32
    %c0_i32_0 = arith.constant 0 : i32
    return %arg0, %c0_i32, %arg1 : i32, i32, i32
  }
  func.func @transform_1(%arg0: i32, %arg1: i32) -> (i32, i32, i32) {
    %c0_i32 = arith.constant 0 : i32
    %c0_i32_0 = arith.constant 0 : i32
    return %arg0, %c0_i32, %arg1 : i32, i32, i32
  }
  func.func @transform_2(%arg0: i32, %arg1: i32) -> (i32, i32, i32) {
    %c0_i32 = arith.constant 0 : i32
    %c0_i32_0 = arith.constant 0 : i32
    %c0_i32_1 = arith.constant 0 : i32
    return %arg0, %c0_i32, %c0_i32_0 : i32, i32, i32
  }
}

</mosaic_0001>

<bundles_post_ra>
// kernel: tpu_custom_call.1
= control target key start
LH: loop header
LB: loop body
LE: loop exit
PB: predicated region body
PF: predicated region fallthrough
CT: control target
= control target key end

     0   :  { %7 = vsyncpa [#allocation3], 0  ;;  %s970_s0 = inlined_call_operand.hbm [shape: f32[2,4,256], index: 0, kind: input, shape index: {}]   ;;  %s971_s1 = inlined_call_operand.hbm [shape: s32[2,1,256], index: 1, kind: input, shape index: {}]   ;;  %s972_s2 = inlined_call_operand.hbm [shape: f32[2,1,256], index: 2, kind: output, shape index: {}]  }
   0x1   :  { %9 = vsyncpa [#allocation3 + $0x1], 0 }
   0x2   :  { %10 = vsyncpa [#allocation6], 0 }
   0x3   :  { %12 = vsyncpa [#allocation6 + $0x1], 0 }
   0x4   :  { %13 = vsyncpa [#allocation4], 0 }
   0x5   :  { %15 = vsyncpa [#allocation4 + $0x1], 0  ;;  %s732_s9 = smov 0   ;;  %s734_s10 = smov 0  }
   0x6   :  { %s736_s11 = smov 0   ;;  %s738_s12 = smov 0  }
   0x7   :  { %s740_s13 = smov 0   ;;  %s742_s14 = smov 0  }
   0x8 LB: > { %s464_s15 = sadd.s32 4294967295, %s710_s14   ;;  %s465_s16 = sadd.s32 4294967294, %s710_s14   ;;  %s710_s14 = sphi %s742_s14, %s21_s14   ;;  %s706_s13 = sphi %s740_s13, %s994_s13   ;;  %s702_s12 = sphi %s738_s12, %s993_s12   ;;  %s698_s11 = sphi %s736_s11, %s992_s11   ;;  %s694_s10 = sphi %s734_s10, %s991_s10   ;;  %s690_s9 = sphi %s732_s9, %s990_s9  }
   0x9   : > { %s33_s17 = sadd.s32 1, %s706_s13  ;;  %s42_s18 = sadd.s32 1, %s698_s11 }
   0xa   : > { %p35_p0 = scmp.ge.s32.totalorder %s33_s17, 2  ;;  %p49_p1 = scmp.ne.s32.totalorder %s698_s11, %s694_s10 }
   0xb   : > { %p50_p2 = scmp.eq.s32.totalorder %s710_s14, 0  ;;  %p55_p3 = scmp.ne.s32.totalorder %s694_s10, %s690_s9 }
   0xc   : > { %s996_s17 = smov (%p35_p0, %s33_s17), 0  ;;  %p56_p5 = scmp.eq.s32.totalorder %s464_s15, 0 }
   0xd   : > { %p773_p4 = por %p50_p2, %p49_p1  ;;  %s37_s20 = ssub.s32 %s706_s13, %s996_s17 }
   0xe   : > { %p107_p6 = scmp.eq.s32.totalorder %s464_s15, 1  ;;  %p40_p7 = scmp.eq.s32.totalorder %s37_s20, 0 }
   0xf   : > { %p779_p8 = por %p56_p5, %p55_p3  ;;  %p113_p10 = scmp.eq.s32.totalorder %s465_s16, 1 }
  0x10   : > { %p783_p9 = por %p107_p6, %p49_p1  ;;  %p505_p13 = scmp.lt.s32.totalorder %s710_s14, 2 }
  0x11   : > { %s976_s21 = scalar_select %p779_p8, 1, 0 }
  0x12   : > { %s977_s22 = scalar_select %p783_p9, 1, 0 }
  0x13   : > { %s788_s23 = scalar_select %p40_p7, %s698_s11, %s42_s18  }
  0x14   : > { %p790_p11 = por %p113_p10, %p55_p3  ;;  %s797_s25 = sand.u32 1, %s698_s11  }
  0x15   : > { %s468_s26 = sshll.u32 %s797_s25, 3  ;;  %s485_s27 = sshll.u32 %s706_s13, 7 }
  0x16   : > { %s978_s24 = scalar_select %p790_p11, 1, 0 }
  0x17   : > { %s804_s30 = scalar_lea.hbm %s970_s0, %s485_s27  ;;  %s137_s3 = scalar_lea.vmem [#allocation2], %s468_s26 }
  0x18   : > { %s147_s4 = sshll.u32 %s137_s3, 4  ;;  %p810_p0 = pnand %p505_p13, %p773_p4  ;;  %s806_s4 = int_to_ptr.vmem [resolvable:$true] %s147_s4 }
  0x19   : > { %s134_s6 = scalar_lea.sflag [#allocation3], %s797_s25  ;;  %s564_s7 = scalar_lea.hbm %s804_s30, 128 }
  0x1a   : > { %p565_p3 = scmp.ne.s32.totalorder %s804_s30, %s564_s7  ;;  %p566_p5 = pneg %p810_p0 }
  0x1b   : > { %s569_s16 = scalar_lea.hbm %s970_s0, 256  ;;  %p570_p4 = scmp.lt.u32.totalorder %s804_s30, %s970_s0 }
  0x1c   : > { %p567_p6 = pnand %p566_p5, %p565_p3  ;;  %p571_p10 = scmp.lt.u32.totalorder %s569_s16, %s564_s7 }
  0x1d   : > { %p573_p12 = scmp.lt.u32.totalorder %s564_s7, %s804_s30 }
  0x1e   : > { %p568_p7 = pneg %p567_p6  ;;  %p572_p13 = por %p571_p10, %p570_p4 }
  0x20   : > { %p574_p1 = por %p573_p12, %p572_p13 }
  0x22   : > { %p575_p2 = pnand %p574_p1, %p568_p7 }
  0x24   : > { %578 = shalt.err (!%p575_p2)
}
  0x25   : > { %s579_s20 = scalar_lea.vmem %s806_s4, 128  ;;  %s712_s26 = smov [#allocation2]  }
  0x26   : > { %p580_p3 = scmp.ne.s32.totalorder %s806_s4, %s579_s20  ;;  %s584_s27 = sshll.u32 %s712_s26, 4  ;;  %s585_s27 = int_to_ptr.vmem [resolvable:$false] %s584_s27 }
  0x27   : > { %s586_s28 = scalar_lea.vmem %s585_s27, 256  ;;  %p587_p9 = scmp.lt.s32.totalorder %s806_s4, %s585_s27 }
  0x28   : > { %p582_p6 = pnand %p580_p3, %p566_p5  ;;  %p588_p4 = scmp.lt.s32.totalorder %s586_s28, %s579_s20 }
  0x2a   : > { %p583_p11 = pneg %p582_p6  ;;  %p589_p10 = por %p588_p4, %p587_p9 }
  0x2c   : > { %p590_p12 = pnand %p589_p10, %p583_p11 }
  0x2e   : > { %593 = shalt.err (!%p590_p12)
}
  0x2f   : > { %497 = dma.hbm_to_vmem [thread:$0]  (!%p810_p0), %s804_s30, 128, %s806_s4, %s134_s6  }
  0x30   : > { %p980_p1 = scmp.lt.s32.totalorder %s710_s14, 3  ;;  %p981_p2 = scmp.ge.s32.totalorder %s710_s14, 1 }
  0x31   : > { %s471_s3 = sshll.u32 %s797_s25, 1  ;;  %s486_s7 = sshll.u32 %s706_s13, 5 }
  0x32   : > { %p846_p7 = pnand %p981_p2, %p980_p1  ;;  %s855_s16 = scalar_lea.hbm %s971_s1, %s486_s7 }
  0x33   : > { %s158_s18 = scalar_lea.vmem [#allocation5], %s471_s3  ;;  %s155_s30 = scalar_lea.sflag [#allocation6], %s797_s25 }
  0x34   : > { %s982_s29 = scalar_select %p846_p7, 1, 0 }
  0x35   : > { %s168_s19 = sshll.u32 %s158_s18, 4  ;;  %s594_s4 = scalar_lea.hbm %s855_s16, 32  ;;  %s169_s19 = int_to_ptr.vmem [resolvable:$true] %s168_s19 }
  0x36   : > { %p595_p9 = scmp.ne.s32.totalorder %s855_s16, %s594_s4  ;;  %s599_s26 = scalar_lea.hbm %s971_s1, 64 }
  0x37   : > { %p600_p3 = scmp.lt.u32.totalorder %s855_s16, %s971_s1  ;;  %p601_p6 = scmp.lt.u32.totalorder %s599_s26, %s594_s4 }
  0x38   : > { %p597_p11 = pnand %p595_p9, %p566_p5  ;;  %p603_p10 = scmp.lt.u32.totalorder %s594_s4, %s855_s16 }
  0x39   : > { %p602_p4 = por %p601_p6, %p600_p3 }
  0x3a   : > { %p598_p13 = pneg %p597_p11 }
  0x3b   : > { %p604_p12 = por %p603_p10, %p602_p4 }
  0x3d   : > { %p605_p1 = pnand %p604_p12, %p598_p13 }
  0x3f   : > { %608 = shalt.err (!%p605_p1)
}
  0x40   : > { %s609_s25 = scalar_lea.vmem %s169_s19, 32  ;;  %s713_s3 = smov [#allocation5]  }
  0x41   : > { %p610_p2 = scmp.ne.s32.totalorder %s169_s19, %s609_s25  ;;  %s614_s7 = sshll.u32 %s713_s3, 4  ;;  %s615_s7 = int_to_ptr.vmem [resolvable:$false] %s614_s7 }
  0x42   : > { %s616_s8 = scalar_lea.vmem %s615_s7, 64  ;;  %p617_p8 = scmp.lt.s32.totalorder %s169_s19, %s615_s7 }
  0x43   : > { %p612_p9 = pnand %p610_p2, %p566_p5  ;;  %p618_p7 = scmp.lt.s32.totalorder %s616_s8, %s609_s25 }
  0x45   : > { %p613_p11 = pneg %p612_p9  ;;  %p619_p3 = por %p618_p7, %p617_p8 }
  0x47   : > { %p620_p6 = pnand %p619_p3, %p613_p11 }
  0x49   : > { %623 = shalt.err (!%p620_p6)
}
  0x4a   : > { %500 = dma.hbm_to_vmem [thread:$0]  (!%p810_p0), %s855_s16, 32, %s169_s19, %s155_s30  }
  0x4b   : > { %p983_p13 = scmp.ne.s32.totalorder %s982_s29, 0 }
  0x4c   : > { %s880_s15 = sand.u32 (!%p983_p13), 1, %s694_s10   ;;  %p984_p5 = scmp.ne.s32.totalorder (!%p983_p13), %s976_s21, 0 }
  0x4d   : > { %177 = sbr.rel (%p983_p13) target bundleno = 192 (0xc0), region = 28  ;;  %s475_s18 = sshll.u32 (!%p983_p13), %s880_s15, 3 }
  0x4e   : > { %s180_s4 = scalar_lea.sflag (!%p983_p13), [#allocation3], %s880_s15  ;;  %s183_s6 = scalar_lea.vmem (!%p983_p13), [#allocation2], %s475_s18 }
  0x54   : > { %677 = dma.done.wait (%p984_p5), %s180_s4, 128  }
  0x55   : > { %679 = vsyncadd (%p984_p5), %s180_s4, 4294967168  ;;  %s476_s5 = sshll.u32 %s880_s15, 1  ;;  %s189_s29 = scalar_lea.sflag [#allocation6], %s880_s15 }
  0x56   : > { %s890_s16 = scalar_lea.vmem [#allocation5], %s476_s5 }
  0x57   : > { %681 = dma.done.wait (%p984_p5), %s189_s29, 32  }
  0x58   : > { %683 = vsyncadd (%p984_p5), %s189_s29, 4294967264  ;;  %v224_v0 = vlaneseq  ;;  %s900_s19 = scalar_lea.vmem [#allocation7], %s476_s5  ;;  %v714_v2 = vmov 0.0   ;;  %vm234_vm1 = vcmask 1043456   ;;  %v229_v3 = vld [vmem:[%s183_s6] sm:$0xff]  ;;  %s487_s21 = sshll.u32 %s702_s12, 5 }
  0x59   : > { %v232_v4 = vcombine.high %v229_v3, %v229_v3  ;;  %v235_v5 = vsel %vm234_vm1, %v229_v3, -inf  ;;  %v230_v40 = vld [vmem:[%s890_s16] sm:$0x3]  ;;  %v715_v62 = vmov 1966171168   ;;  %s357_s30 = sshll.u32 %s900_s19, 4  ;;  %s918_s27 = scalar_lea.hbm %s972_s2, %s487_s21  ;;  %s920_s30 = int_to_ptr.vmem [resolvable:$true] %s357_s30 }
  0x5a   : > { %vm896_vm0 = vcmp.lt.s32.totalorder %v224_v0, 256  ;;  %v236_v6 = vrot.slane %v235_v5, 4  ;;  %v281_v37 = vshrl.u32 %v224_v0, 7  ;;  %v322_v63 = vunpack.c.l.s4 %v715_v62  ;;  %s343_s28 = scalar_lea.sflag [#allocation4], %s880_s15  ;;  %s624_s25 = scalar_lea.vmem %s920_s30, 32 }
  0x5b   : > { %228 = vst.msk [vmem:[%s900_s19] sm:$0x3] %vm896_vm0, %v714_v2  ;;  %v242_v7 = vsel %vm234_vm1, %v232_v4, -inf  ;;  %p625_p8 = scmp.ne.s32.totalorder %s920_s30, %s624_s25  ;;  %p987_p0 = scmp.ne.s32.totalorder %s977_s22, 0 }
  0x5c   : > { %v237_v8 = vmax.f32 %v235_v5, %v236_v6  ;;  %v243_v9 = vrot.slane %v242_v7, 4  ;;  %v284_v39 = vsub.s32 0, %v281_v37  ;;  %v288_v41 = vsub.s32 1, %v281_v37  ;;  %s716_s12 = smov [#allocation7]  }
  0x5d   : > { %v323_v5 = vunpack.c.0.s8 %v322_v63  ;;  %p626_p7 = pnand %p625_p8, %p987_p0  ;;  %s628_s3 = sshll.u32 %s716_s12, 4  ;;  %s629_s3 = int_to_ptr.vmem [resolvable:$false] %s628_s3 }
  0x5e   : > { %v238_v10 = vrot.slane %v237_v8, 2  ;;  %v244_v11 = vmax.f32 %v242_v7, %v243_v9  ;;  %v285_v42 = vrot.slane %v230_v40, %v284_v39  ;;  %v289_v43 = vrot.slane %v230_v40, %v288_v41  ;;  %s630_s7 = scalar_lea.vmem %s629_s3, 64  ;;  %p631_p10 = scmp.lt.s32.totalorder %s920_s30, %s629_s3 }
  0x5f   : > { %v326_v9 = vsub.s32 %v323_v5, %v281_v37  ;;  %p627_p4 = pneg %p626_p7  ;;  %p632_p12 = scmp.lt.s32.totalorder %s630_s7, %s624_s25 }
  0x60   : > { %v239_v12 = vmax.f32 %v237_v8, %v238_v10  ;;  %v245_v13 = vrot.slane %v244_v11, 2  ;;  %vm290_vm2 = vcmp.eq.s32.totalorder %v281_v37, %v285_v42  ;;  %vm291_vm3 = vcmp.eq.s32.totalorder %v281_v37, %v289_v43 }
  0x61   : > { %v478_v47 = vsel %vm290_vm2, 1.0, %v714_v2  ;;  %v479_v49 = vsel %vm291_vm3, 1.0, %v714_v2  ;;  %p633_p1 = por %p632_p12, %p631_p10 }
  0x62   : > { %v240_v14 = vrot.slane %v239_v12, 1  ;;  %v246_v15 = vmax.f32 %v244_v11, %v245_v13 }
  0x63   : > { %p634_p2 = pnand %p633_p1, %p627_p4 }
  0x64   : > { %v241_v16 = vmax.f32 %v239_v12, %v240_v14  ;;  %v247_v17 = vrot.slane %v246_v15, 1  ;;  %v317_v12 = vld [vmem:[%s900_s19] sm:$0x3] }
  0x66   : > { %v248_v18 = vmax.f32 %v246_v15, %v247_v17 }
  0x68   : > { %v251_v19 = vcombine.low %v241_v16, %v248_v18 }
  0x6a   : > { %v253_v20 = vsub.f32 %v229_v3, %v251_v19 }
  0x6c   : > { %v254_v21 = vmul.f32 1.442695, %v253_v20 }
  0x6e   : > { %558 = vpow2.f32 %v254_v21 }
  0x78   : > { %v559_v22 = vpop.eup %558 }
  0x79   : > { %v257_v23 = vcombine.high %v559_v22, %v559_v22  ;;  %v259_v24 = vsel %vm234_vm1, %v559_v22, 0.0 }
  0x7a   : > { %v260_v25 = vrot.slane %v259_v24, 4 }
  0x7b   : > { %v266_v26 = vsel %vm234_vm1, %v257_v23, 0.0 }
  0x7c   : > { %v261_v27 = vadd.f32 %v260_v25, %v259_v24  ;;  %v267_v28 = vrot.slane %v266_v26, 4 }
  0x7e   : > { %v262_v29 = vrot.slane %v261_v27, 2  ;;  %v268_v30 = vadd.f32 %v267_v28, %v266_v26 }
  0x80   : > { %v263_v31 = vadd.f32 %v262_v29, %v261_v27  ;;  %v269_v32 = vrot.slane %v268_v30, 2 }
  0x82   : > { %v264_v33 = vrot.slane %v263_v31, 1  ;;  %v270_v34 = vadd.f32 %v269_v32, %v268_v30 }
  0x84   : > { %v265_v35 = vadd.f32 %v264_v33, %v263_v31  ;;  %v271_v36 = vrot.slane %v270_v34, 1 }
  0x86   : > { %v272_v38 = vadd.f32 %v271_v36, %v270_v34  ;;  %560 = vrcp.f32 %v265_v35 }
  0x88   : > { %562 = vrcp.f32 %v272_v38 }
  0x90   : > { %v561_v44 = vpop.eup %560 }
  0x92   : > { %v563_v45 = vpop.eup %562 }
  0x93   : > { %v277_v46 = vcombine.low %v561_v44, %v563_v45 }
  0x95   : > { %v279_v48 = vmul.f32 %v559_v22, %v277_v46 }
  0x97   : > { %v297_v50 = vcombine.high %v279_v48, %v279_v48  ;;  %v299_v51 = vsub.f32 %v478_v47, %v279_v48 }
  0x99   : > { %v300_v52 = vsub.f32 %v479_v49, %v297_v50  ;;  %v301_v53 = vmul.f32 %v299_v51, %v299_v51 }
  0x9b   : > { %v302_v54 = vmul.f32 %v300_v52, %v300_v52  ;;  %v303_v55 = vsel %vm234_vm1, %v301_v53, 0.0 }
  0x9c   : > { %v304_v56 = vrot.slane %v303_v55, 4 }
  0x9d   : > { %v310_v57 = vsel %vm234_vm1, %v302_v54, 0.0 }
  0x9e   : > { %v305_v58 = vadd.f32 %v304_v56, %v303_v55  ;;  %v311_v59 = vrot.slane %v310_v57, 4 }
  0xa0   : > { %v306_v60 = vrot.slane %v305_v58, 2  ;;  %v312_v61 = vadd.f32 %v311_v59, %v310_v57 }
  0xa2   : > { %v307_v0 = vadd.f32 %v306_v60, %v305_v58  ;;  %v313_v2 = vrot.slane %v312_v61, 2 }
  0xa4   : > { %v308_v3 = vrot.slane %v307_v0, 1  ;;  %v314_v4 = vadd.f32 %v313_v2, %v312_v61 }
  0xa6   : > { %v309_v6 = vadd.f32 %v308_v3, %v307_v0  ;;  %v315_v7 = vrot.slane %v314_v4, 1 }
  0xa8   : > { %v316_v8 = vadd.f32 %v315_v7, %v314_v4 }
  0xaa   : > { %v320_v10 = vcombine.low %v309_v6, %v316_v8 }
  0xac   : > { %v327_v11 = vrot.slane %v320_v10, %v326_v9 }
  0xae   : > { %v334_v13 = vrot.slane %v327_v11, %v326_v9 }
  0xb0   : > { %v336_v14 = vadd.f32 %v334_v13, %v317_v12 }
  0xb2   : > { %341 = vst.msk [vmem:[%s900_s19] sm:$0x3] %vm896_vm0, %v336_v14 }
  0xb3   : > { %637 = shalt.err (!%p634_p2)
}
  0xb4   : > { %s638_s8 = scalar_lea.hbm %s918_s27, 32  ;;  %s642_s4 = scalar_lea.hbm %s972_s2, 64 }
  0xb5   : > { %p639_p9 = scmp.ne.s32.totalorder %s918_s27, %s638_s8  ;;  %p643_p6 = scmp.lt.u32.totalorder %s918_s27, %s972_s2 }
  0xb6   : > { %p644_p13 = scmp.lt.u32.totalorder %s642_s4, %s638_s8  ;;  %p646_p8 = scmp.lt.u32.totalorder %s638_s8, %s918_s27 }
  0xb7   : > { %p640_p11 = pnand %p639_p9, %p987_p0 }
  0xb8   : > { %p645_p5 = por %p644_p13, %p643_p6 }
  0xb9   : > { %p641_p3 = pneg %p640_p11 }
  0xba   : > { %p647_p7 = por %p646_p8, %p645_p5 }
  0xbc   : > { %p648_p4 = pnand %p647_p7, %p641_p3 }
  0xbe   : > { %651 = shalt.err (!%p648_p4)
}
  0xbf   : > { %492 = dma.vmem_to_hbm [thread:$0]  (%p987_p0), %s920_s30, 32, %s918_s27, %s343_s28  }
  0xc0 PF: > { %s369_s29 = sand.u32 1, %s690_s9   ;;  %p988_p10 = scmp.ne.s32.totalorder %s978_s24, 0 }
  0xc1   : > { %p989_p12 = scmp.ge.s32.totalorder %s710_s14, 2  ;;  %s370_s16 = scalar_lea.sflag [#allocation4], %s369_s29 }
  0xc3   : > { %p502_p1 = pnand %p989_p12, %p988_p10 }
  0xc5   : > { %685 = dma.done.wait (!%p502_p1), %s370_s16, 32  }
  0xc6   : > { %687 = vsyncadd (!%p502_p1), %s370_s16, 4294967264  ;;  %s21_s14 = sadd.s32 1, %s710_s14   ;;  %s990_s9 = smov %s694_s10 }
  0xc7   : > { %p18_p2 = scmp.ge.s32.totalorder %s21_s14, 4   ;;  %s991_s10 = smov %s698_s11 }
  0xc8   : > { %s992_s11 = smov %s788_s23  ;;  %s993_s12 = smov %s706_s13 }
  0xc9   : > { %s994_s13 = smov %s996_s17  ;;  %20 = sbr.rel (!%p18_p2) target bundleno = 8 (0x8), region = 90 }
  0xd0   :  { %375 = vsyncpa [#allocation3], 1 }
  0xd1   :  { %377 = vsyncpa [#allocation3 + $0x1], 1 }
  0xd2   :  { %378 = vsyncpa [#allocation6], 1 }
  0xd3   :  { %380 = vsyncpa [#allocation6 + $0x1], 1 }
  0xd4   :  { %381 = vsyncpa [#allocation4], 1 }
  0xd5   :  { %383 = vsyncpa [#allocation4 + $0x1], 1 }

</bundles_post_ra>
